<compile_context>
chip_gen: v7x
topology: tpu7x:2x2x1
jax: 0.10.0
libtpu: 0.0.40
codegen_flags: <defaults>
</compile_context>

<pallas_src>
import functools

import jax
import jax.numpy as jnp
from jax.experimental import pallas as pl
from jax.experimental.pallas import tpu as pltpu

LANE = 128
SUBLANE = 8


def _round_up(n, m):
    return ((n + m - 1) // m) * m


def mlp_kernel(x_ref,
               w1_ref, b1_ref,
               w2_ref, b2_ref,
               w3_ref, b3_ref,
               w4_ref, b4_ref,
               w5_ref, b5_ref,
               w6_ref, b6_ref,
               o_ref):
    """Fused (Linear -> ReLU) x 5 -> Linear on one batch tile.

    Weights are lane-dense zero-padded (output cols are multiples of 128);
    biases are (1, N_pad) f32 and broadcast in the add.  Dot inputs are cast
    to the weight dtype (bf16 on v6e/v7x) with f32 MXU accumulation; bias
    add / ReLU stay in f32 (v5e VPU has no bf16).
    """
    def layer(h, w_ref, b_ref, relu):
        y = jnp.dot(h.astype(w_ref.dtype), w_ref[...],
                    preferred_element_type=jnp.float32) + b_ref[...]
        return jnp.maximum(y, 0.0) if relu else y

    h = x_ref[...]
    h = layer(h, w1_ref, b1_ref, True)
    h = layer(h, w2_ref, b2_ref, True)
    h = layer(h, w3_ref, b3_ref, True)
    h = layer(h, w4_ref, b4_ref, True)
    h = layer(h, w5_ref, b5_ref, True)
    h = layer(h, w6_ref, b6_ref, False)
    o_ref[...] = h.astype(o_ref.dtype)


def init_linear_params(key, fan_in, fan_out):
    """PyTorch nn.Linear default init: U(-1/sqrt(fan_in), 1/sqrt(fan_in))."""
    kw, kb = jax.random.split(key)
    bound = 1.0 / jnp.sqrt(jnp.float32(fan_in))
    # stored as (in, out) so the kernel does x @ W  (== torch x @ W.T + b)
    w = jax.random.uniform(kw, (fan_in, fan_out), jnp.float32, -bound, bound)
    b = jax.random.uniform(kb, (1, fan_out), jnp.float32, -bound, bound)
    return w, b


def make_params(key, input_size, output_size):
    """Unpadded params, semantically identical to the PyTorch module."""
    sizes = [input_size, 50, 100, 300, 100, 50, output_size]
    keys = jax.random.split(key, len(sizes) - 1)
    return [init_linear_params(keys[i], sizes[i], sizes[i + 1])
            for i in range(len(sizes) - 1)]


def pad_params(params, weight_dtype=jnp.float32):
    """Zero-pad weight output dims (and hidden input dims) to multiples of 128;
    the first layer's K stays at the raw feature count so the input slab is not
    padded in HBM.  Biases stay (1, N_pad) f32; zero rows/cols contribute
    nothing, so the padded forward equals the unpadded one on the real slice."""
    padded = []
    for idx, (w, b) in enumerate(params):
        k, n = w.shape
        k_pad = k if idx == 0 else _round_up(k, LANE)
        n_pad = _round_up(n, LANE)
        w_p = jnp.zeros((k_pad, n_pad), weight_dtype).at[:k, :n].set(
            w.astype(weight_dtype))
        b_p = jnp.zeros((1, n_pad), jnp.float32).at[:, :n].set(b)
        padded.append((w_p, b_p))
    return padded


def choose_tile_m(batch, weight_dtype=jnp.float32, max_tile=1024):
    """Batch tile: sublane-aligned, capped so VMEM stays small even on v7x,
    and split into >=2 grid steps once the batch allows it so the 'parallel'
    batch axis can shard across v7x's two TensorCores (neutral on v5e/v6e)."""
    sub = 16 if weight_dtype == jnp.bfloat16 else SUBLANE
    batch_padded = _round_up(max(batch, sub), sub)
    if batch_padded >= 2 * sub:
        tile = _round_up(pl.cdiv(batch_padded, 2), sub)
    else:
        tile = batch_padded
    return int(min(max_tile, tile))


def make_forward(padded_params, real_layer_dims, output_size, tile_m):
    """Build a jitted forward: row-pad x -> single fused pallas_call -> slice."""
    in_features = real_layer_dims[0][0]
    out_pad = padded_params[-1][0].shape[1]
    w_itemsize = jnp.dtype(padded_params[0][0].dtype).itemsize

    # Constant index_map => block never changes across the grid; single-buffer
    # it so default 2-deep pipelining doesn't double the resident VMEM.
    def resident_spec(shape):
        return pl.BlockSpec(shape, lambda i: (0, 0),
                            pipeline_mode=pl.Buffered(1))

    def forward(x):
        batch = x.shape[0]
        batch_padded = _round_up(max(batch, tile_m), tile_m)

        # Pad batch rows only; the feature dim keeps its real (narrow) width.
        xp = jnp.zeros((batch_padded, in_features), jnp.float32)
        xp = xp.at[:batch, :].set(x)

        grid = (batch_padded // tile_m,)

        in_specs = [pl.BlockSpec((tile_m, in_features), lambda i: (i, 0))]
        flat_args = [xp]
        for w, b in padded_params:
            in_specs.append(resident_spec(w.shape))
            in_specs.append(resident_spec(b.shape))
            flat_args.append(w)
            flat_args.append(b)

        # Real (unpadded) work so XLA schedules this as the cheap call it is.
        flops = 2 * batch * sum(k * n for k, n in real_layer_dims)
        bytes_accessed = (batch * in_features * 4
                          + sum(k * n * w_itemsize + n * 4
                                for k, n in real_layer_dims)
                          + batch * output_size * 4)

        out_padded = pl.pallas_call(
            mlp_kernel,
            out_shape=jax.ShapeDtypeStruct((batch_padded, out_pad), jnp.float32),
            grid=grid,
            in_specs=in_specs,
            out_specs=pl.BlockSpec((tile_m, out_pad), lambda i: (i, 0)),
            compiler_params=pltpu.CompilerParams(
                dimension_semantics=("parallel",),
                # Budget against v7x's 32 MiB scoped / 64 MiB physical VMEM
                # (v5e/v6e have more headroom).
                vmem_limit_bytes=32 * 1024 * 1024),
            cost_estimate=pl.CostEstimate(
                flops=flops, transcendentals=0, bytes_accessed=bytes_accessed),
        )(*flat_args)

        # Slice the true (batch, output_size) result out of the lane-dense slab.
        return out_padded[:batch, :output_size]

    return jax.jit(forward)


def reference_forward(x, params):
    h = x
    for i, (w, b) in enumerate(params):
        h = h @ w + b
        if i < len(params) - 1:
            h = jnp.maximum(h, 0.0)
    return h


if __name__ == "__main__":
    key = jax.random.PRNGKey(0)
    k_x, k_p, k_x2 = jax.random.split(key, 3)

    input_size = 8    # number of house features (x_data.shape[1])
    output_size = 1   # predicted price

    params = make_params(k_p, input_size, output_size)
    real_layer_dims = tuple((int(w.shape[0]), int(w.shape[1])) for w, _ in params)

    # --- f32 path: matches the PyTorch f32 forward (tight tolerance) ---
    batch = 8
    x = jax.random.normal(k_x, (batch, input_size), dtype=jnp.float32)
    tile_m = choose_tile_m(batch, jnp.float32)
    fwd_f32 = make_forward(pad_params(params, jnp.float32),
                           real_layer_dims, output_size, tile_m)
    out = jax.block_until_ready(fwd_f32(x))
    ref = reference_forward(x, params)
    assert out.shape == (batch, output_size)
    assert jnp.allclose(out, ref, atol=1e-4, rtol=1e-4)

    # --- bf16-weight path: MXU-native on v6e/v7x, f32 accumulation; batch=32
    #     gives a 2-step grid so v7x's second TensorCore gets work ---
    batch2 = 32
    x2 = jax.random.normal(k_x2, (batch2, input_size), dtype=jnp.float32)
    tile_m2 = choose_tile_m(batch2, jnp.bfloat16)
    fwd_bf16 = make_forward(pad_params(params, jnp.bfloat16),
                            real_layer_dims, output_size, tile_m2)
    out2 = jax.block_until_ready(fwd_bf16(x2))
    ref2 = reference_forward(x2, params)
    assert out2.shape == (batch2, output_size)
    assert jnp.allclose(out2, ref2, atol=5e-2, rtol=5e-2)

    # TODO(synk): the MSELoss / Adam / DataLoader training loop from the source
    # script is host-side training code, not part of the forward kernel.
    print("KERNEL_OK")
</pallas_src>

<mosaic_0001>
module attributes {stable_mosaic.version = 11 : i64} {
  func.func @mlp_kernel(%arg0: i32, %arg1: memref<8x8xf32, #tpu.memory_space<vmem>>, %arg2: memref<8x128xf32, #tpu.memory_space<vmem>>, %arg3: memref<1x128xf32, #tpu.memory_space<vmem>>, %arg4: memref<128x128xf32, #tpu.memory_space<vmem>>, %arg5: memref<1x128xf32, #tpu.memory_space<vmem>>, %arg6: memref<128x384xf32, #tpu.memory_space<vmem>>, %arg7: memref<1x384xf32, #tpu.memory_space<vmem>>, %arg8: memref<384x128xf32, #tpu.memory_space<vmem>>, %arg9: memref<1x128xf32, #tpu.memory_space<vmem>>, %arg10: memref<128x128xf32, #tpu.memory_space<vmem>>, %arg11: memref<1x128xf32, #tpu.memory_space<vmem>>, %arg12: memref<128x128xf32, #tpu.memory_space<vmem>>, %arg13: memref<1x128xf32, #tpu.memory_space<vmem>>, %arg14: memref<8x128xf32, #tpu.memory_space<vmem>>) attributes {dimension_semantics = [#tpu.dimension_semantics<parallel>], iteration_bounds = array<i64: 1>, scalar_prefetch = 0 : i64, scratch_operands = 0 : i64, tpu.core_type = #tpu.core_type<tc>, window_params = [{transform_indices = @transform_0, window_bounds = array<i64: 8, 8>}, {pipeline_mode = #tpu.pipeline_mode<synchronous>, transform_indices = @transform_1, window_bounds = array<i64: 8, 128>}, {pipeline_mode = #tpu.pipeline_mode<synchronous>, transform_indices = @transform_2, window_bounds = array<i64: 1, 128>}, {pipeline_mode = #tpu.pipeline_mode<synchronous>, transform_indices = @transform_3, window_bounds = array<i64: 128, 128>}, {pipeline_mode = #tpu.pipeline_mode<synchronous>, transform_indices = @transform_4, window_bounds = array<i64: 1, 128>}, {pipeline_mode = #tpu.pipeline_mode<synchronous>, transform_indices = @transform_5, window_bounds = array<i64: 128, 384>}, {pipeline_mode = #tpu.pipeline_mode<synchronous>, transform_indices = @transform_6, window_bounds = array<i64: 1, 384>}, {pipeline_mode = #tpu.pipeline_mode<synchronous>, transform_indices = @transform_7, window_bounds = array<i64: 384, 128>}, {pipeline_mode = #tpu.pipeline_mode<synchronous>, transform_indices = @transform_8, window_bounds = array<i64: 1, 128>}, {pipeline_mode = #tpu.pipeline_mode<synchronous>, transform_indices = @transform_9, window_bounds = array<i64: 128, 128>}, {pipeline_mode = #tpu.pipeline_mode<synchronous>, transform_indices = @transform_10, window_bounds = array<i64: 1, 128>}, {pipeline_mode = #tpu.pipeline_mode<synchronous>, transform_indices = @transform_11, window_bounds = array<i64: 128, 128>}, {pipeline_mode = #tpu.pipeline_mode<synchronous>, transform_indices = @transform_12, window_bounds = array<i64: 1, 128>}, {transform_indices = @transform_13, window_bounds = array<i64: 8, 128>}]} {
    %c0 = arith.constant 0 : index
    %c0_0 = arith.constant 0 : index
    %0 = vector.load %arg1[%c0, %c0_0] : memref<8x8xf32, #tpu.memory_space<vmem>>, vector<8x8xf32>
    %c0_1 = arith.constant 0 : index
    %c0_2 = arith.constant 0 : index
    %1 = vector.load %arg2[%c0_1, %c0_2] : memref<8x128xf32, #tpu.memory_space<vmem>>, vector<8x128xf32>
    %cst = arith.constant dense<0.000000e+00> : vector<8x128xf32>
    %2 = tpu.matmul %0, %1, %cst {dimension_numbers = #tpu.dot_dimension_numbers<[1], [0], [0], [1], [0, 0, 1, 1], [], []>} : vector<8x8xf32>, vector<8x128xf32>, vector<8x128xf32> -> vector<8x128xf32>
    %c0_3 = arith.constant 0 : index
    %c0_4 = arith.constant 0 : index
    %3 = vector.load %arg3[%c0_3, %c0_4] : memref<1x128xf32, #tpu.memory_space<vmem>>, vector<1x128xf32>
    %4 = vector.broadcast %3 : vector<1x128xf32> to vector<8x128xf32>
    %5 = arith.addf %2, %4 : vector<8x128xf32>
    %cst_5 = arith.constant 0.000000e+00 : f32
    %6 = vector.broadcast %cst_5 : f32 to vector<8x128xf32>
    %7 = arith.maximumf %5, %6 : vector<8x128xf32>
    %c0_6 = arith.constant 0 : index
    %c0_7 = arith.constant 0 : index
    %8 = vector.load %arg4[%c0_6, %c0_7] : memref<128x128xf32, #tpu.memory_space<vmem>>, vector<128x128xf32>
    %cst_8 = arith.constant dense<0.000000e+00> : vector<8x128xf32>
    %9 = tpu.matmul %7, %8, %cst_8 {dimension_numbers = #tpu.dot_dimension_numbers<[1], [0], [0], [1], [0, 0, 1, 1], [], []>} : vector<8x128xf32>, vector<128x128xf32>, vector<8x128xf32> -> vector<8x128xf32>
    %c0_9 = arith.constant 0 : index
    %c0_10 = arith.constant 0 : index
    %10 = vector.load %arg5[%c0_9, %c0_10] : memref<1x128xf32, #tpu.memory_space<vmem>>, vector<1x128xf32>
    %11 = vector.broadcast %10 : vector<1x128xf32> to vector<8x128xf32>
    %12 = arith.addf %9, %11 : vector<8x128xf32>
    %cst_11 = arith.constant 0.000000e+00 : f32
    %13 = vector.broadcast %cst_11 : f32 to vector<8x128xf32>
    %14 = arith.maximumf %12, %13 : vector<8x128xf32>
    %c0_12 = arith.constant 0 : index
    %c0_13 = arith.constant 0 : index
    %15 = vector.load %arg6[%c0_12, %c0_13] : memref<128x384xf32, #tpu.memory_space<vmem>>, vector<128x384xf32>
    %cst_14 = arith.constant dense<0.000000e+00> : vector<8x384xf32>
    %16 = tpu.matmul %14, %15, %cst_14 {dimension_numbers = #tpu.dot_dimension_numbers<[1], [0], [0], [1], [0, 0, 1, 1], [], []>} : vector<8x128xf32>, vector<128x384xf32>, vector<8x384xf32> -> vector<8x384xf32>
    %c0_15 = arith.constant 0 : index
    %c0_16 = arith.constant 0 : index
    %17 = vector.load %arg7[%c0_15, %c0_16] : memref<1x384xf32, #tpu.memory_space<vmem>>, vector<1x384xf32>
    %18 = vector.broadcast %17 : vector<1x384xf32> to vector<8x384xf32>
    %19 = arith.addf %16, %18 : vector<8x384xf32>
    %cst_17 = arith.constant 0.000000e+00 : f32
    %20 = vector.broadcast %cst_17 : f32 to vector<8x384xf32>
    %21 = arith.maximumf %19, %20 : vector<8x384xf32>
    %c0_18 = arith.constant 0 : index
    %c0_19 = arith.constant 0 : index
    %22 = vector.load %arg8[%c0_18, %c0_19] : memref<384x128xf32, #tpu.memory_space<vmem>>, vector<384x128xf32>
    %cst_20 = arith.constant dense<0.000000e+00> : vector<8x128xf32>
    %23 = tpu.matmul %21, %22, %cst_20 {dimension_numbers = #tpu.dot_dimension_numbers<[1], [0], [0], [1], [0, 0, 1, 1], [], []>} : vector<8x384xf32>, vector<384x128xf32>, vector<8x128xf32> -> vector<8x128xf32>
    %c0_21 = arith.constant 0 : index
    %c0_22 = arith.constant 0 : index
    %24 = vector.load %arg9[%c0_21, %c0_22] : memref<1x128xf32, #tpu.memory_space<vmem>>, vector<1x128xf32>
    %25 = vector.broadcast %24 : vector<1x128xf32> to vector<8x128xf32>
    %26 = arith.addf %23, %25 : vector<8x128xf32>
    %cst_23 = arith.constant 0.000000e+00 : f32
    %27 = vector.broadcast %cst_23 : f32 to vector<8x128xf32>
    %28 = arith.maximumf %26, %27 : vector<8x128xf32>
    %c0_24 = arith.constant 0 : index
    %c0_25 = arith.constant 0 : index
    %29 = vector.load %arg10[%c0_24, %c0_25] : memref<128x128xf32, #tpu.memory_space<vmem>>, vector<128x128xf32>
    %cst_26 = arith.constant dense<0.000000e+00> : vector<8x128xf32>
    %30 = tpu.matmul %28, %29, %cst_26 {dimension_numbers = #tpu.dot_dimension_numbers<[1], [0], [0], [1], [0, 0, 1, 1], [], []>} : vector<8x128xf32>, vector<128x128xf32>, vector<8x128xf32> -> vector<8x128xf32>
    %c0_27 = arith.constant 0 : index
    %c0_28 = arith.constant 0 : index
    %31 = vector.load %arg11[%c0_27, %c0_28] : memref<1x128xf32, #tpu.memory_space<vmem>>, vector<1x128xf32>
    %32 = vector.broadcast %31 : vector<1x128xf32> to vector<8x128xf32>
    %33 = arith.addf %30, %32 : vector<8x128xf32>
    %cst_29 = arith.constant 0.000000e+00 : f32
    %34 = vector.broadcast %cst_29 : f32 to vector<8x128xf32>
    %35 = arith.maximumf %33, %34 : vector<8x128xf32>
    %c0_30 = arith.constant 0 : index
    %c0_31 = arith.constant 0 : index
    %36 = vector.load %arg12[%c0_30, %c0_31] : memref<128x128xf32, #tpu.memory_space<vmem>>, vector<128x128xf32>
    %cst_32 = arith.constant dense<0.000000e+00> : vector<8x128xf32>
    %37 = tpu.matmul %35, %36, %cst_32 {dimension_numbers = #tpu.dot_dimension_numbers<[1], [0], [0], [1], [0, 0, 1, 1], [], []>} : vector<8x128xf32>, vector<128x128xf32>, vector<8x128xf32> -> vector<8x128xf32>
    %c0_33 = arith.constant 0 : index
    %c0_34 = arith.constant 0 : index
    %38 = vector.load %arg13[%c0_33, %c0_34] : memref<1x128xf32, #tpu.memory_space<vmem>>, vector<1x128xf32>
    %39 = vector.broadcast %38 : vector<1x128xf32> to vector<8x128xf32>
    %40 = arith.addf %37, %39 : vector<8x128xf32>
    %c0_35 = arith.constant 0 : index
    %c0_36 = arith.constant 0 : index
    %41 = vector.load %arg14[%c0_35, %c0_36] : memref<8x128xf32, #tpu.memory_space<vmem>>, vector<8x128xf32>
    tpu.vector_store %arg14[%c0_35, %c0_36], %40 {strides = array<i32>} : memref<8x128xf32, #tpu.memory_space<vmem>>, vector<8x128xf32>,
    return
  }
  func.func @transform_0(%arg0: i32) -> (i32, i32) {
    %c0_i32 = arith.constant 0 : i32
    %c0_i32_0 = arith.constant 0 : i32
    return %arg0, %c0_i32 : i32, i32
  }
  func.func @transform_1(%arg0: i32) -> (i32, i32) {
    %c0_i32 = arith.constant 0 : i32
    %c0_i32_0 = arith.constant 0 : i32
    %c0_i32_1 = arith.constant 0 : i32
    return %c0_i32, %c0_i32_0 : i32, i32
  }
  func.func @transform_2(%arg0: i32) -> (i32, i32) {
    %c0_i32 = arith.constant 0 : i32
    %c0_i32_0 = arith.constant 0 : i32
    %c0_i32_1 = arith.constant 0 : i32
    return %c0_i32, %c0_i32_0 : i32, i32
  }
  func.func @transform_3(%arg0: i32) -> (i32, i32) {
    %c0_i32 = arith.constant 0 : i32
    %c0_i32_0 = arith.constant 0 : i32
    %c0_i32_1 = arith.constant 0 : i32
    return %c0_i32, %c0_i32_0 : i32, i32
  }
  func.func @transform_4(%arg0: i32) -> (i32, i32) {
    %c0_i32 = arith.constant 0 : i32
    %c0_i32_0 = arith.constant 0 : i32
    %c0_i32_1 = arith.constant 0 : i32
    return %c0_i32, %c0_i32_0 : i32, i32
  }
  func.func @transform_5(%arg0: i32) -> (i32, i32) {
    %c0_i32 = arith.constant 0 : i32
    %c0_i32_0 = arith.constant 0 : i32
    %c0_i32_1 = arith.constant 0 : i32
    return %c0_i32, %c0_i32_0 : i32, i32
  }
  func.func @transform_6(%arg0: i32) -> (i32, i32) {
    %c0_i32 = arith.constant 0 : i32
    %c0_i32_0 = arith.constant 0 : i32
    %c0_i32_1 = arith.constant 0 : i32
    return %c0_i32, %c0_i32_0 : i32, i32
  }
  func.func @transform_7(%arg0: i32) -> (i32, i32) {
    %c0_i32 = arith.constant 0 : i32
    %c0_i32_0 = arith.constant 0 : i32
    %c0_i32_1 = arith.constant 0 : i32
    return %c0_i32, %c0_i32_0 : i32, i32
  }
  func.func @transform_8(%arg0: i32) -> (i32, i32) {
    %c0_i32 = arith.constant 0 : i32
    %c0_i32_0 = arith.constant 0 : i32
    %c0_i32_1 = arith.constant 0 : i32
    return %c0_i32, %c0_i32_0 : i32, i32
  }
  func.func @transform_9(%arg0: i32) -> (i32, i32) {
    %c0_i32 = arith.constant 0 : i32
    %c0_i32_0 = arith.constant 0 : i32
    %c0_i32_1 = arith.constant 0 : i32
    return %c0_i32, %c0_i32_0 : i32, i32
  }
  func.func @transform_10(%arg0: i32) -> (i32, i32) {
    %c0_i32 = arith.constant 0 : i32
    %c0_i32_0 = arith.constant 0 : i32
    %c0_i32_1 = arith.constant 0 : i32
    return %c0_i32, %c0_i32_0 : i32, i32
  }
  func.func @transform_11(%arg0: i32) -> (i32, i32) {
    %c0_i32 = arith.constant 0 : i32
    %c0_i32_0 = arith.constant 0 : i32
    %c0_i32_1 = arith.constant 0 : i32
    return %c0_i32, %c0_i32_0 : i32, i32
  }
  func.func @transform_12(%arg0: i32) -> (i32, i32) {
    %c0_i32 = arith.constant 0 : i32
    %c0_i32_0 = arith.constant 0 : i32
    %c0_i32_1 = arith.constant 0 : i32
    return %c0_i32, %c0_i32_0 : i32, i32
  }
  func.func @transform_13(%arg0: i32) -> (i32, i32) {
    %c0_i32 = arith.constant 0 : i32
    %c0_i32_0 = arith.constant 0 : i32
    return %arg0, %c0_i32 : i32, i32
  }
}

</mosaic_0001>

<bundles_post_ra>
// kernel: forward.1
= control target key start
LH: loop header
LB: loop body
LE: loop exit
PB: predicated region body
PF: predicated region fallthrough
CT: control target
= control target key end

     0   :  { %18 = vsyncpa [#allocation3], 0  ;;  %s1906_s0 = inlined_call_operand.hbm [shape: f32[8,8], index: 0, kind: input, shape index: {}]   ;;  %s1907_s1 = inlined_call_operand.hbm [shape: f32[8,128], index: 1, kind: input, shape index: {}]   ;;  %s1908_s2 = inlined_call_operand.hbm [shape: f32[1,128], index: 2, kind: input, shape index: {}]   ;;  %s1909_s3 = inlined_call_operand.hbm [shape: f32[128,128], index: 3, kind: input, shape index: {}]   ;;  %s1910_s4 = inlined_call_operand.vmem [shape: f32[1,128], index: 4, kind: input, shape index: {}]   ;;  %s1911_s5 = inlined_call_operand.hbm [shape: f32[128,384], index: 5, kind: input, shape index: {}]   ;;  %s1912_s6 = inlined_call_operand.vmem [shape: f32[1,384], index: 6, kind: input, shape index: {}]   ;;  %s1913_s7 = inlined_call_operand.hbm [shape: f32[384,128], index: 7, kind: input, shape index: {}]   ;;  %s1914_s8 = inlined_call_operand.vmem [shape: f32[1,128], index: 8, kind: input, shape index: {}]   ;;  %s1915_s9 = inlined_call_operand.hbm [shape: f32[128,128], index: 9, kind: input, shape index: {}]   ;;  %s1916_s10 = inlined_call_operand.vmem [shape: f32[1,128], index: 10, kind: input, shape index: {}]   ;;  %s1917_s11 = inlined_call_operand.hbm [shape: f32[128,128], index: 11, kind: input, shape index: {}]   ;;  %s1918_s12 = inlined_call_operand.vmem [shape: f32[1,128], index: 12, kind: input, shape index: {}]   ;;  %s1919_s13 = inlined_call_operand.vmem [shape: f32[8,128], index: 13, kind: output, shape index: {}]  }
   0x1   :  { %19 = vsyncpa [#allocation5], 0 }
   0x2   :  { %20 = vsyncpa [#allocation8], 0 }
   0x3   :  { %21 = vsyncpa [#allocation11], 0 }
   0x4   :  { %22 = vsyncpa [#allocation14], 0  ;;  %s1620_s25 = smov [#allocation4]   ;;  %s1621_s27 = smov [#allocation7]  }
   0x5   :  { %s39_s26 = sshll.u32 %s1620_s25, 4  ;;  %s58_s28 = sshll.u32 %s1621_s27, 4  ;;  %s40_s26 = int_to_ptr.vmem [resolvable:$true] %s39_s26  ;;  %s1705_s28 = int_to_ptr.vmem [resolvable:$true] %s58_s28 }
   0x6   :  { %s1434_s14 = scalar_lea.hbm %s1907_s1, 128 }
   0x7   :  { %p1435_p0 = scmp.ne.s32.totalorder %s1907_s1, %s1434_s14  ;;  %p1438_p1 = scmp.lt.u32.totalorder %s1434_s14, %s1907_s1 }
   0x9   :  { %p1440_p2 = pnand %p1438_p1, %p1435_p0 }
   0xb   :  { %1443 = shalt.err (!%p1440_p2)
}
   0xc   :  { %s1444_s19 = scalar_lea.vmem %s40_s26, 128  ;;  %p1449_p4 = scmp.lt.s32.totalorder %s40_s26, %s40_s26 }
   0xd   :  { %p1445_p3 = scmp.ne.s32.totalorder %s40_s26, %s1444_s19  ;;  %p1450_p5 = scmp.lt.s32.totalorder %s1444_s19, %s1444_s19 }
   0xf   :  { %p1451_p6 = por %p1450_p5, %p1449_p4 }
  0x11   :  { %p1452_p7 = pnand %p1451_p6, %p1445_p3 }
  0x13   :  { %1455 = shalt.err (!%p1452_p7)
}
  0x14   :  { %42 = dma.hbm_to_vmem [thread:$0]  %s1907_s1, 128, %s40_s26, [#allocation5]  }
  0x15   :  { %s1456_s24 = scalar_lea.hbm %s1909_s3, 2048 }
  0x16   :  { %p1457_p8 = scmp.ne.s32.totalorder %s1909_s3, %s1456_s24  ;;  %p1460_p9 = scmp.lt.u32.totalorder %s1456_s24, %s1909_s3 }
  0x18   :  { %p1462_p10 = pnand %p1460_p9, %p1457_p8 }
  0x1a   :  { %1465 = shalt.err (!%p1462_p10)
}
  0x1b   :  { %s1466_s14 = scalar_lea.vmem %s1705_s28, 2048  ;;  %p1471_p12 = scmp.lt.s32.totalorder %s1705_s28, %s1705_s28 }
  0x1c   :  { %p1467_p11 = scmp.ne.s32.totalorder %s1705_s28, %s1466_s14  ;;  %p1472_p13 = scmp.lt.s32.totalorder %s1466_s14, %s1466_s14 }
  0x1e   :  { %p1473_p0 = por %p1472_p13, %p1471_p12 }
  0x20   :  { %p1474_p1 = pnand %p1473_p0, %p1467_p11 }
  0x22   :  { %1477 = shalt.err (!%p1474_p1)
}
  0x23   :  { %s1622_s1 = smov 128   ;;  %s1623_s26 = smov 8  }
  0x24   :  { %64 = dma.hbm_to_vmem [thread:$0]  %s1909_s3, 2048, %s1705_s28, [#allocation8], %s1622_s1, %s1622_s1, %s1623_s26  }
  0x25   :  { %s1624_s17 = smov [#allocation10]   ;;  %s1625_s19 = smov [#allocation2]  }
  0x26   :  { %s86_s18 = sshll.u32 %s1624_s17, 4  ;;  %s29_s20 = sshll.u32 %s1625_s19, 4  ;;  %s87_s18 = int_to_ptr.vmem [resolvable:$true] %s86_s18  ;;  %s30_s20 = int_to_ptr.vmem [resolvable:$true] %s29_s20 }
  0x27   :  { %s1478_s23 = scalar_lea.hbm %s1913_s7, 6144 }
  0x28   :  { %p1479_p2 = scmp.ne.s32.totalorder %s1913_s7, %s1478_s23  ;;  %p1482_p3 = scmp.lt.u32.totalorder %s1478_s23, %s1913_s7 }
  0x2a   :  { %p1484_p4 = pnand %p1482_p3, %p1479_p2 }
  0x2c   :  { %1487 = shalt.err (!%p1484_p4)
}
  0x2d   :  { %s1488_s3 = scalar_lea.vmem %s87_s18, 6144  ;;  %p1493_p6 = scmp.lt.s32.totalorder %s87_s18, %s87_s18 }
  0x2e   :  { %p1489_p5 = scmp.ne.s32.totalorder %s87_s18, %s1488_s3  ;;  %p1494_p7 = scmp.lt.s32.totalorder %s1488_s3, %s1488_s3 }
  0x30   :  { %p1495_p8 = por %p1494_p7, %p1493_p6 }
  0x32   :  { %p1496_p9 = pnand %p1495_p8, %p1489_p5 }
  0x34   :  { %1499 = shalt.err (!%p1496_p9)
}
  0x35   :  { %92 = dma.hbm_to_vmem [thread:$0]  %s1913_s7, 6144, %s87_s18, [#allocation11], %s1622_s1, %s1622_s1, %s1623_s26  }
  0x36   :  { %s1500_s16 = scalar_lea.hbm %s1906_s0, 128 }
  0x37   :  { %p1501_p10 = scmp.ne.s32.totalorder %s1906_s0, %s1500_s16  ;;  %p1504_p11 = scmp.lt.u32.totalorder %s1500_s16, %s1906_s0 }
  0x39   :  { %p1506_p12 = pnand %p1504_p11, %p1501_p10 }
  0x3b   :  { %1509 = shalt.err (!%p1506_p12)
}
  0x3c   :  { %s1510_s23 = scalar_lea.vmem %s30_s20, 128  ;;  %p1515_p0 = scmp.lt.s32.totalorder %s30_s20, %s30_s20 }
  0x3d   :  { %p1511_p13 = scmp.ne.s32.totalorder %s30_s20, %s1510_s23  ;;  %p1516_p1 = scmp.lt.s32.totalorder %s1510_s23, %s1510_s23 }
  0x3f   :  { %p1517_p2 = por %p1516_p1, %p1515_p0 }
  0x41   :  { %p1518_p3 = pnand %p1517_p2, %p1511_p13 }
  0x43   :  { %1521 = shalt.err (!%p1518_p3)
}
  0x44   :  { %32 = dma.hbm_to_vmem [thread:$0]  %s1906_s0, 128, %s30_s20, [#allocation3]  }
  0x45   :  { %s1626_s24 = smov [#allocation6]   ;;  %s1627_s27 = smov [#allocation9]  }
  0x46   :  { %s49_s25 = sshll.u32 %s1626_s24, 4  ;;  %s72_s29 = sshll.u32 %s1627_s27, 4  ;;  %s50_s25 = int_to_ptr.vmem [resolvable:$true] %s49_s25  ;;  %s1766_s29 = int_to_ptr.vmem [resolvable:$true] %s72_s29 }
  0x47   :  { %s1522_s30 = scalar_lea.hbm %s1908_s2, 16 }
  0x48   :  { %p1523_p4 = scmp.ne.s32.totalorder %s1908_s2, %s1522_s30  ;;  %p1526_p5 = scmp.lt.u32.totalorder %s1522_s30, %s1908_s2 }
  0x4a   :  { %p1528_p6 = pnand %p1526_p5, %p1523_p4 }
  0x4c   :  { %1531 = shalt.err (!%p1528_p6)
}
  0x4d   :  { %s1532_s0 = scalar_lea.vmem %s50_s25, 16  ;;  %s1536_s20 = scalar_lea.vmem %s50_s25, 32 }
  0x4e   :  { %p1533_p7 = scmp.ne.s32.totalorder %s50_s25, %s1532_s0  ;;  %p1537_p8 = scmp.lt.s32.totalorder %s50_s25, %s50_s25 }
  0x4f   :  { %p1538_p9 = scmp.lt.s32.totalorder %s1536_s20, %s1532_s0 }
  0x51   :  { %p1539_p10 = por %p1538_p9, %p1537_p8 }
  0x53   :  { %p1540_p11 = pnand %p1539_p10, %p1533_p7 }
  0x55   :  { %1543 = shalt.err (!%p1540_p11)
}
  0x56   :  { %52 = dma.hbm_to_vmem [thread:$0]  %s1908_s2, 16, %s50_s25, [#allocation5]  }
  0x57   :  { %s1544_s7 = scalar_lea.hbm %s1911_s5, 6144 }
  0x58   :  { %p1545_p12 = scmp.ne.s32.totalorder %s1911_s5, %s1544_s7  ;;  %p1548_p13 = scmp.lt.u32.totalorder %s1544_s7, %s1911_s5 }
  0x5a   :  { %p1550_p0 = pnand %p1548_p13, %p1545_p12 }
  0x5c   :  { %1553 = shalt.err (!%p1550_p0)
}
  0x5d   :  { %s1554_s28 = scalar_lea.vmem %s1766_s29, 6144  ;;  %p1559_p2 = scmp.lt.s32.totalorder %s1766_s29, %s1766_s29 }
  0x5e   :  { %p1555_p1 = scmp.ne.s32.totalorder %s1766_s29, %s1554_s28  ;;  %p1560_p3 = scmp.lt.s32.totalorder %s1554_s28, %s1554_s28 }
  0x60   :  { %p1561_p4 = por %p1560_p3, %p1559_p2 }
  0x62   :  { %p1562_p5 = pnand %p1561_p4, %p1555_p1 }
  0x64   :  { %1565 = shalt.err (!%p1562_p5)
}
  0x65   :  { %s1628_s2 = smov 384   ;;  %s1629_s25 = smov 24  }
  0x66   :  { %78 = dma.hbm_to_vmem [thread:$0]  %s1911_s5, 6144, %s1766_s29, [#allocation8], %s1628_s2, %s1628_s2, %s1629_s25  }
  0x67   :  { %s1630_s15 = smov [#allocation12]   ;;  %s1631_s17 = smov [#allocation13]  }
  0x68   :  { %s100_s16 = sshll.u32 %s1630_s15, 4  ;;  %s114_s0 = sshll.u32 %s1631_s17, 4  ;;  %s101_s16 = int_to_ptr.vmem [resolvable:$true] %s100_s16  ;;  %s1797_s0 = int_to_ptr.vmem [resolvable:$true] %s114_s0 }
  0x69   :  { %s1566_s21 = scalar_lea.hbm %s1915_s9, 2048 }
  0x6a   :  { %p1567_p6 = scmp.ne.s32.totalorder %s1915_s9, %s1566_s21  ;;  %p1570_p7 = scmp.lt.u32.totalorder %s1566_s21, %s1915_s9 }
  0x6c   :  { %p1572_p8 = pnand %p1570_p7, %p1567_p6 }
  0x6e   :  { %1575 = shalt.err (!%p1572_p8)
}
  0x6f   :  { %s1576_s5 = scalar_lea.vmem %s101_s16, 2048  ;;  %p1581_p10 = scmp.lt.s32.totalorder %s101_s16, %s101_s16 }
  0x70   :  { %p1577_p9 = scmp.ne.s32.totalorder %s101_s16, %s1576_s5  ;;  %p1582_p11 = scmp.lt.s32.totalorder %s1576_s5, %s1576_s5 }
  0x72   :  { %p1583_p12 = por %p1582_p11, %p1581_p10 }
  0x74   :  { %p1584_p13 = pnand %p1583_p12, %p1577_p9 }
  0x76   :  { %1587 = shalt.err (!%p1584_p13)
}
  0x77   :  { %106 = dma.hbm_to_vmem [thread:$0]  %s1915_s9, 2048, %s101_s16, [#allocation11], %s1622_s1, %s1622_s1, %s1623_s26  }
  0x78   :  { %s1588_s28 = scalar_lea.hbm %s1917_s11, 2048 }
  0x79   :  { %p1589_p0 = scmp.ne.s32.totalorder %s1917_s11, %s1588_s28  ;;  %p1592_p1 = scmp.lt.u32.totalorder %s1588_s28, %s1917_s11 }
  0x7b   :  { %p1594_p2 = pnand %p1592_p1, %p1589_p0 }
  0x7d   :  { %1597 = shalt.err (!%p1594_p2)
}
  0x7e   :  { %s1598_s15 = scalar_lea.vmem %s1797_s0, 2048  ;;  %p1603_p4 = scmp.lt.s32.totalorder %s1797_s0, %s1797_s0 }
  0x7f   :  { %p1599_p3 = scmp.ne.s32.totalorder %s1797_s0, %s1598_s15  ;;  %p1604_p5 = scmp.lt.s32.totalorder %s1598_s15, %s1598_s15 }
  0x81   :  { %p1605_p6 = por %p1604_p5, %p1603_p4 }
  0x83   :  { %p1606_p7 = pnand %p1605_p6, %p1599_p3 }
  0x85   :  { %1609 = shalt.err (!%p1606_p7)
}
  0x86   :  { %120 = dma.hbm_to_vmem [thread:$0]  %s1917_s11, 2048, %s1797_s0, [#allocation14], %s1622_s1, %s1622_s1, %s1623_s26  }
  0x87   :  { %1610 = dma.done.wait [#allocation3], 128  }
  0x88   :  { %1611 = vsyncadd [#allocation3], 4294967168 }
  0x89   :  { %1612 = dma.done.wait [#allocation5], 144  }
  0x8a   :  { %1613 = vsyncadd [#allocation5], 4294967152 }
  0x8b   :  { %1614 = dma.done.wait [#allocation8], 8192  }
  0x8c   :  { %1615 = vsyncadd [#allocation8], 4294959104 }
  0x8d   :  { %1616 = dma.done.wait [#allocation11], 8192  }
  0x8e   :  { %1617 = vsyncadd [#allocation11], 4294959104 }
  0x8f   :  { %1618 = dma.done.wait [#allocation14], 2048  }
  0x90   :  { %1619 = vsyncadd [#allocation14], 4294965248  ;;  %v1632_v0 = vmov 0.0   ;;  %vm1633_vm0 = vmmov 0   ;;  %v1634_v1 = vmov 0.0|0.0   ;;  %vm156_vm1 = vcmask 64512  }
  0x91   :  { %1055 = vmatprep.subr.mxu0 %v1632_v0  ;;  %1057 = vmatprep.mubr.msk.f32.mxu0 %vm1633_vm0, %v1632_v0  ;;  %v148_v2 = vld [vmem:[#allocation4] sm:$0xff]  ;;  %v147_v3 = vld [vmem:[#allocation2] sm:$0xff]  ;;  %v231_v4 = vld [vmem:[#allocation7] sm:$0xff] }
  0x92   :  { %1235 = vmatprep.subr.bf16.mxu1 %v1634_v1  ;;  %1092 = vmatprep.mubr.msk.f32.mxu1 %vm1633_vm0, %v1632_v0  ;;  %v232_v5 = vld [vmem:[#allocation7 + $0x8] sm:$0xff]  ;;  %v233_v6 = vld [vmem:[#allocation7 + $0x10] sm:$0xff]  ;;  %v234_v7 = vld [vmem:[#allocation7 + $0x18] sm:$0xff] }
  0x93   :  { %1056 = vmatpush3.msra.mxu0 %v148_v2  ;;  %v1236_v8 = vpack.c.bf16 %v232_v5, %v231_v4  ;;  %v1239_v9 = vpack.c.bf16 %v234_v7, %v233_v6  ;;  %v235_v10 = vld [vmem:[#allocation7 + $0x20] sm:$0xff]  ;;  %v236_v11 = vld [vmem:[#allocation7 + $0x28] sm:$0xff]  ;;  %v237_v13 = vld [vmem:[#allocation7 + $0x30] sm:$0xff] }
  0x94   :  { %1058 = vmatmul.mubr.msk.f32.vlgmr.msra.gmra.mrb[0].mxu0 %vm156_vm1, %v147_v3  ;;  %v1242_v12 = vpack.c.bf16 %v236_v11, %v235_v10  ;;  %v238_v14 = vld [vmem:[#allocation7 + $0x38] sm:$0xff]  ;;  %v239_v16 = vld [vmem:[#allocation7 + $0x40] sm:$0xff]  ;;  %v240_v17 = vld [vmem:[#allocation7 + $0x48] sm:$0xff] }
  0x95   :  { %454 = vmatprep.mubr.f32.mxu0 %v1632_v0  ;;  %1237 = vmatpush3.bf16.msra.mxu1 %v1236_v8  ;;  %v1245_v15 = vpack.c.bf16 %v238_v14, %v237_v13  ;;  %v1248_v18 = vpack.c.bf16 %v240_v17, %v239_v16  ;;  %v241_v19 = vld [vmem:[#allocation7 + $0x50] sm:$0xff]  ;;  %v242_v20 = vld [vmem:[#allocation7 + $0x58] sm:$0xff]  ;;  %v243_v22 = vld [vmem:[#allocation7 + $0x60] sm:$0xff] }
  0x96   :  { %1238 = vmatprep.subr.bf16.mxu1 %v1634_v1  ;;  %v1251_v21 = vpack.c.bf16 %v242_v20, %v241_v19  ;;  %v244_v23 = vld [vmem:[#allocation7 + $0x68] sm:$0xff]  ;;  %v245_v25 = vld [vmem:[#allocation7 + $0x70] sm:$0xff]  ;;  %v246_v26 = vld [vmem:[#allocation7 + $0x78] sm:$0xff] }
  0x97   :  { %v1254_v24 = vpack.c.bf16 %v244_v23, %v243_v22  ;;  %v1257_v27 = vpack.c.bf16 %v246_v26, %v245_v25  ;;  %v326_v28 = vld [vmem:[#allocation9 + $0x8] sm:$0xff]  ;;  %v329_v29 = vld [vmem:[#allocation9 + $0x20] sm:$0xff]  ;;  %v328_v32 = vld [vmem:[#allocation9 + $0x18] sm:$0xff] }
  0x98   :  { %v325_v30 = vld [vmem:[#allocation9] sm:$0xff]  ;;  %v1259_v31 = vpack.c.bf16 %v329_v29, %v326_v28  ;;  %v332_v34 = vld [vmem:[#allocation9 + $0x38] sm:$0xff]  ;;  %v335_v35 = vld [vmem:[#allocation9 + $0x50] sm:$0xff] }
  0x99   :  { %1240 = vmatpush3.bf16.msra.mxu1 %v1239_v9  ;;  %v1261_v33 = vpack.c.bf16 %v328_v32, %v325_v30  ;;  %v331_v36 = vld [vmem:[#allocation9 + $0x30] sm:$0xff]  ;;  %v1263_v37 = vpack.c.bf16 %v335_v35, %v332_v34  ;;  %v334_v38 = vld [vmem:[#allocation9 + $0x48] sm:$0xff]  ;;  %v341_v41 = vld [vmem:[#allocation9 + $0x80] sm:$0xff] }
  0x9a   :  { %1241 = vmatprep.subr.bf16.mxu1 %v1634_v1  ;;  %1260 = vmatprep.subr.bf16.mxu0 %v1259_v31  ;;  %v1265_v39 = vpack.c.bf16 %v334_v38, %v331_v36  ;;  %v338_v40 = vld [vmem:[#allocation9 + $0x68] sm:$0xff]  ;;  %v337_v43 = vld [vmem:[#allocation9 + $0x60] sm:$0xff]  ;;  %v340_v44 = vld [vmem:[#allocation9 + $0x78] sm:$0xff] }
  0x9b   :  { %1262 = vmatpush1.bf16.msra.mxu0 %v1261_v33  ;;  %v1267_v42 = vpack.c.bf16 %v341_v41, %v338_v40  ;;  %v1269_v45 = vpack.c.bf16 %v340_v44, %v337_v43  ;;  %v344_v46 = vld [vmem:[#allocation9 + $0x98] sm:$0xff]  ;;  %v347_v47 = vld [vmem:[#allocation9 + $0xb0] sm:$0xff]  ;;  %v346_v50 = vld [vmem:[#allocation9 + $0xa8] sm:$0xff] }
  0x9c   :  { %1264 = vmatprep.subr.bf16.mxu0 %v1263_v37  ;;  %v1271_v48 = vpack.c.bf16 %v347_v47, %v344_v46  ;;  %v343_v49 = vld [vmem:[#allocation9 + $0x90] sm:$0xff]  ;;  %v350_v52 = vld [vmem:[#allocation9 + $0xc8] sm:$0xff]  ;;  %v353_v53 = vld [vmem:[#allocation9 + $0xe0] sm:$0xff] }
  0x9d   :  { %1243 = vmatpush3.bf16.msra.mxu1 %v1242_v12  ;;  %v1273_v51 = vpack.c.bf16 %v346_v50, %v343_v49  ;;  %v1275_v54 = vpack.c.bf16 %v353_v53, %v350_v52  ;;  %v349_v55 = vld [vmem:[#allocation9 + $0xc0] sm:$0xff]  ;;  %v352_v56 = vld [vmem:[#allocation9 + $0xd8] sm:$0xff]  ;;  %v359_v59 = vld [vmem:[#allocation9 + $0x110] sm:$0xff] }
  0x9e   :  { %1244 = vmatprep.subr.bf16.mxu1 %v1634_v1  ;;  %v1277_v57 = vpack.c.bf16 %v352_v56, %v349_v55  ;;  %v356_v58 = vld [vmem:[#allocation9 + $0xf8] sm:$0xff]  ;;  %v355_v61 = vld [vmem:[#allocation9 + $0xf0] sm:$0xff]  ;;  %v358_v62 = vld [vmem:[#allocation9 + $0x108] sm:$0xff] }
  0x9f   :  { %1266 = vmatpush1.bf16.msra.mxu0 %v1265_v39  ;;  %v1279_v60 = vpack.c.bf16 %v359_v59, %v356_v58  ;;  %v1281_v63 = vpack.c.bf16 %v358_v62, %v355_v61  ;;  %v362_v2 = vld [vmem:[#allocation9 + $0x128] sm:$0xff]  ;;  %v365_v3 = vld [vmem:[#allocation9 + $0x140] sm:$0xff]  ;;  %v364_v6 = vld [vmem:[#allocation9 + $0x138] sm:$0xff] }
  0xa0   :  { %1268 = vmatprep.subr.bf16.mxu0 %v1267_v42  ;;  %v1283_v4 = vpack.c.bf16 %v365_v3, %v362_v2  ;;  %v361_v5 = vld [vmem:[#allocation9 + $0x120] sm:$0xff]  ;;  %v927_v8 = vld [vmem:[#allocation6] ss:$0 sm:$0xff]  ;;  %v327_v9 = vld [vmem:[#allocation9 + $0x10] sm:$0xff] }
  0xa1   :  { %1246 = vmatpush3.bf16.msra.mxu1 %v1245_v15  ;;  %v1285_v7 = vpack.c.bf16 %v364_v6, %v361_v5  ;;  %v330_v10 = vld [vmem:[#allocation9 + $0x28] sm:$0xff]  ;;  %v333_v16 = vld [vmem:[#allocation9 + $0x40] sm:$0xff]  ;;  %v336_v17 = vld [vmem:[#allocation9 + $0x58] sm:$0xff] }
  0xa2   :  { %1247 = vmatprep.subr.bf16.mxu1 %v1634_v1  ;;  %v1292_v14 = vpack.c.bf16 %v330_v10, %v327_v9  ;;  %v339_v19 = vld [vmem:[#allocation9 + $0x70] sm:$0xff]  ;;  %v342_v20 = vld [vmem:[#allocation9 + $0x88] sm:$0xff]  ;;  %v345_v22 = vld [vmem:[#allocation9 + $0xa0] sm:$0xff] }
  0xa3   :  { %1270 = vmatpush1.bf16.msra.mxu0 %v1269_v45  ;;  %v348_v23 = vld [vmem:[#allocation9 + $0xb8] sm:$0xff]  ;;  %v351_v25 = vld [vmem:[#allocation9 + $0xd0] sm:$0xff]  ;;  %v354_v26 = vld [vmem:[#allocation9 + $0xe8] sm:$0xff] }
  0xa4   :  { %1272 = vmatprep.subr.bf16.mxu0 %v1271_v48  ;;  %v357_v28 = vld [vmem:[#allocation9 + $0x100] sm:$0xff]  ;;  %v360_v29 = vld [vmem:[#allocation9 + $0x118] sm:$0xff]  ;;  %v363_v31 = vld [vmem:[#allocation9 + $0x130] sm:$0xff] }
  0xa5   :  { %1249 = vmatpush3.bf16.msra.mxu1 %v1248_v18  ;;  %v1295_v18 = vpack.c.bf16 %v336_v17, %v333_v16  ;;  %v1307_v30 = vpack.c.bf16 %v360_v29, %v357_v28  ;;  %v366_v32 = vld [vmem:[#allocation9 + $0x148] sm:$0xff]  ;;  %v368_v34 = vld [vmem:[#allocation9 + $0x158] sm:$0xff]  ;;  %v371_v35 = vld [vmem:[#allocation9 + $0x170] sm:$0xff] }
  0xa6   :  { %1250 = vmatprep.subr.bf16.mxu1 %v1634_v1  ;;  %v1310_v33 = vpack.c.bf16 %v366_v32, %v363_v31  ;;  %v1287_v36 = vpack.c.bf16 %v371_v35, %v368_v34  ;;  %v367_v37 = vld [vmem:[#allocation9 + $0x150] sm:$0xff]  ;;  %v370_v38 = vld [vmem:[#allocation9 + $0x168] sm:$0xff]  ;;  %v369_v39 = vld [vmem:[#allocation9 + $0x160] sm:$0xff] }
  0xa7   :  { %1274 = vmatpush1.bf16.msra.mxu0 %v1273_v51  ;;  %v1289_v40 = vpack.c.bf16 %v370_v38, %v367_v37  ;;  %v372_v41 = vld [vmem:[#allocation9 + $0x178] sm:$0xff]  ;;  %v550_v43 = vld [vmem:[#allocation10 + $0x80] sm:$0xff]  ;;  %v551_v44 = vld [vmem:[#allocation10 + $0x88] sm:$0xff] }
  0xa8   :  { %1276 = vmatprep.subr.bf16.mxu0 %v1275_v54  ;;  %v1313_v42 = vpack.c.bf16 %v372_v41, %v369_v39  ;;  %v1315_v45 = vpack.c.bf16 %v551_v44, %v550_v43  ;;  %v929_v46 = vld [vmem:[%s1910_s4] ss:$0 sm:$0xff]  ;;  %v566_v47 = vld [vmem:[#allocation10 + $0x100] sm:$0xff]  ;;  %v552_v52 = vld [vmem:[#allocation10 + $0x90] sm:$0xff] }
  0xa9   :  { %1252 = vmatpush3.bf16.msra.mxu1 %v1251_v21  ;;  %v1298_v21 = vpack.c.bf16 %v342_v20, %v339_v19  ;;  %v567_v48 = vld [vmem:[#allocation10 + $0x108] sm:$0xff]  ;;  %v534_v49 = vld [vmem:[#allocation10] sm:$0xff]  ;;  %v553_v53 = vld [vmem:[#allocation10 + $0x98] sm:$0xff] }
  0xaa   :  { %1253 = vmatprep.subr.bf16.mxu1 %v1634_v1  ;;  %v535_v50 = vld [vmem:[#allocation10 + $0x8] sm:$0xff]  ;;  %v1348_v56 = vpack.c.bf16 %v567_v48, %v566_v47  ;;  %v568_v58 = vld [vmem:[#allocation10 + $0x110] sm:$0xff]  ;;  %v1319_v61 = vpack.c.bf16 %v553_v53, %v552_v52  ;;  %v554_v2 = vld [vmem:[#allocation10 + $0xa0] sm:$0xff] }
  0xab   :  { %1278 = vmatpush1.bf16.msra.mxu0 %v1277_v57  ;;  %v1317_v57 = vpack.c.bf16 %v535_v50, %v534_v49  ;;  %v536_v62 = vld [vmem:[#allocation10 + $0x10] sm:$0xff]  ;;  %v555_v3 = vld [vmem:[#allocation10 + $0xa8] sm:$0xff]  ;;  %v570_v6 = vld [vmem:[#allocation10 + $0x120] sm:$0xff] }
  0xac   :  { %1280 = vmatprep.subr.bf16.mxu0 %v1279_v60  ;;  %v569_v60 = vld [vmem:[#allocation10 + $0x118] sm:$0xff]  ;;  %v538_v9 = vld [vmem:[#allocation10 + $0x20] sm:$0xff]  ;;  %v539_v10 = vld [vmem:[#allocation10 + $0x28] sm:$0xff] }
  0xad   :  { %1255 = vmatpush3.bf16.msra.mxu1 %v1254_v24  ;;  %v1301_v24 = vpack.c.bf16 %v348_v23, %v345_v22  ;;  %v573_v16 = vld [vmem:[#allocation10 + $0x138] sm:$0xff]  ;;  %v558_v20 = vld [vmem:[#allocation10 + $0xc0] sm:$0xff]  ;;  %v543_v28 = vld [vmem:[#allocation10 + $0x48] sm:$0xff] }
  0xae   :  { %1256 = vmatprep.subr.bf16.mxu1 %v1634_v1  ;;  %v541_v19 = vld [vmem:[#allocation10 + $0x38] sm:$0xff]  ;;  %v560_v29 = vld [vmem:[#allocation10 + $0xd0] sm:$0xff]  ;;  %v562_v38 = vld [vmem:[#allocation10 + $0xe0] sm:$0xff] }
  0xaf   :  { %1282 = vmatpush1.bf16.msra.mxu0 %v1281_v63  ;;  %v537_v63 = vld [vmem:[#allocation10 + $0x18] sm:$0xff]  ;;  %v563_v39 = vld [vmem:[#allocation10 + $0xe8] sm:$0xff]  ;;  %v580_v49 = vld [vmem:[#allocation10 + $0x170] sm:$0xff] }
  0xb0   :  { %1284 = vmatprep.subr.bf16.mxu0 %v1283_v4  ;;  %v1351_v4 = vpack.c.bf16 %v569_v60, %v568_v58  ;;  %v1321_v5 = vpack.c.bf16 %v537_v63, %v536_v62  ;;  %v577_v34 = vld [vmem:[#allocation10 + $0x158] sm:$0xff]  ;;  %v579_v43 = vld [vmem:[#allocation10 + $0x168] sm:$0xff]  ;;  %v1339_v44 = vpack.c.bf16 %v563_v39, %v562_v38  ;;  %v564_v52 = vld [vmem:[#allocation10 + $0xf0] sm:$0xff]  ;;  %v375_v58 = vlaneseq }
  0xb1   :  { %1258 = vmatpush3.bf16.msra.mxu1 %v1257_v27  ;;  %v1304_v27 = vpack.c.bf16 %v354_v26, %v351_v25  ;;  %v575_v25 = vld [vmem:[#allocation10 + $0x148] sm:$0xff]  ;;  %v545_v37 = vld [vmem:[#allocation10 + $0x58] sm:$0xff]  ;;  %v824_v38 = vld [vmem:[#allocation13] sm:$0xff] }
  0xb2   :  { %1291 = vmatprep.subr.bf16.mxu1 %v1634_v1  ;;  %v547_v47 = vld [vmem:[#allocation10 + $0x68] sm:$0xff]  ;;  %v581_v50 = vld [vmem:[#allocation10 + $0x178] sm:$0xff] }
  0xb3   :  { %1286 = vmatpush1.bf16.msra.mxu0 %v1285_v7  ;;  %v571_v7 = vld [vmem:[#allocation10 + $0x128] sm:$0xff]  ;;  %v565_v53 = vld [vmem:[#allocation10 + $0xf8] sm:$0xff] }
  0xb4   :  { %1288 = vmatprep.subr.bf16.mxu0 %v1287_v36  ;;  %v544_v36 = vld [vmem:[#allocation10 + $0x50] sm:$0xff]  ;;  %v825_v39 = vld [vmem:[#allocation13 + $0x8] sm:$0xff] }
  0xb5   :  { %v1337_v41 = vpack.c.bf16 %v545_v37, %v544_v36  ;;  %v373_v62 = vld [vmem:[%s1912_s6] sm:$0x7]  ;;  %v745_v36 = vld [vmem:[#allocation12 + $0x78] sm:$0xff] }
  0xb7   :  { %1290 = vmatpush1.bf16.msra.mxu0 %v1289_v40 }
  0xb8   :  { %1316 = vmatprep.subr.bf16.mxu0 %v1315_v45 }
 0x167   :  { %v226_v11 = vpop.f32.mrb[0].mxu0 }
 0x168   :  { %v227_v12 = vadd.f32 %v927_v8, %v226_v11  ;;  %v1059_v13 = vpop.f32.mrb[1].mxu0  ;;  %v1323_v8 = vpack.c.bf16 %v555_v3, %v554_v2  ;;  %v556_v11 = vld [vmem:[#allocation10 + $0xb0] sm:$0xff] }
 0x169   :  { %v1354_v13 = vpack.c.bf16 %v571_v7, %v570_v6 }
 0x16a   :  { %v230_v15 = vmax.f32 %v227_v12, 0.0  ;;  %v557_v12 = vld [vmem:[#allocation10 + $0xb8] sm:$0xff] }
 0x16b   :  { %v1327_v17 = vpack.c.bf16 %v557_v12, %v556_v11  ;;  %v730_v11 = vld [vmem:[#allocation12] sm:$0xff]  ;;  %v731_v12 = vld [vmem:[#allocation12 + $0x8] sm:$0xff] }
 0x16c   :  { %1093 = vmatmul.mubr.f32.vlgmr.msra.gmra.mrb[0].mxu1 %v230_v15  ;;  %v572_v15 = vld [vmem:[#allocation10 + $0x130] sm:$0xff] }
 0x16d   :  { %1293 = vmatpush3.bf16.msra.mxu1 %v1292_v14  ;;  %1127 = vmatprep.mubr.msk.f32.mxu1 %vm1633_vm0, %v1632_v0  ;;  %v1325_v14 = vpack.c.bf16 %v539_v10, %v538_v9  ;;  %v1357_v22 = vpack.c.bf16 %v573_v16, %v572_v15  ;;  %v1372_v16 = vpack.c.bf16 %v731_v12, %v730_v11 }
 0x16e   :  { %1294 = vmatprep.subr.bf16.mxu1 %v1634_v1 }
 0x171   :  { %1296 = vmatpush3.bf16.msra.mxu1 %v1295_v18  ;;  %v540_v18 = vld [vmem:[#allocation10 + $0x30] sm:$0xff] }
 0x172   :  { %1297 = vmatprep.subr.bf16.mxu1 %v1634_v1  ;;  %v1329_v23 = vpack.c.bf16 %v541_v19, %v540_v18  ;;  %v732_v18 = vld [vmem:[#allocation12 + $0x10] sm:$0xff]  ;;  %v733_v19 = vld [vmem:[#allocation12 + $0x18] sm:$0xff] }
 0x175   :  { %1299 = vmatpush3.bf16.msra.mxu1 %v1298_v21  ;;  %v559_v21 = vld [vmem:[#allocation10 + $0xc8] sm:$0xff] }
 0x176   :  { %1300 = vmatprep.subr.bf16.mxu1 %v1634_v1  ;;  %v1331_v26 = vpack.c.bf16 %v559_v21, %v558_v20  ;;  %v1375_v20 = vpack.c.bf16 %v733_v19, %v732_v18  ;;  %v734_v21 = vld [vmem:[#allocation12 + $0x20] sm:$0xff] }
 0x179   :  { %1302 = vmatpush3.bf16.msra.mxu1 %v1301_v24  ;;  %v574_v24 = vld [vmem:[#allocation10 + $0x140] sm:$0xff] }
 0x17a   :  { %1303 = vmatprep.subr.bf16.mxu1 %v1634_v1  ;;  %v1360_v31 = vpack.c.bf16 %v575_v25, %v574_v24  ;;  %v736_v24 = vld [vmem:[#allocation12 + $0x30] sm:$0xff]  ;;  %v737_v25 = vld [vmem:[#allocation12 + $0x38] sm:$0xff] }
 0x17d   :  { %1305 = vmatpush3.bf16.msra.mxu1 %v1304_v27  ;;  %v542_v27 = vld [vmem:[#allocation10 + $0x40] sm:$0xff] }
 0x17e   :  { %1306 = vmatprep.subr.bf16.mxu1 %v1634_v1  ;;  %v1333_v32 = vpack.c.bf16 %v543_v28, %v542_v27  ;;  %v738_v27 = vld [vmem:[#allocation12 + $0x40] sm:$0xff]  ;;  %v739_v28 = vld [vmem:[#allocation12 + $0x48] sm:$0xff] }
 0x181   :  { %1308 = vmatpush3.bf16.msra.mxu1 %v1307_v30  ;;  %v561_v30 = vld [vmem:[#allocation10 + $0xd8] sm:$0xff] }
 0x182   :  { %1309 = vmatprep.subr.bf16.mxu1 %v1634_v1  ;;  %v1335_v35 = vpack.c.bf16 %v561_v30, %v560_v29  ;;  %v1384_v29 = vpack.c.bf16 %v739_v28, %v738_v27  ;;  %v741_v30 = vld [vmem:[#allocation12 + $0x58] sm:$0xff] }
 0x185   :  { %1311 = vmatpush3.bf16.msra.mxu1 %v1310_v33  ;;  %v576_v33 = vld [vmem:[#allocation10 + $0x150] sm:$0xff] }
 0x186   :  { %1312 = vmatprep.subr.bf16.mxu1 %v1634_v1  ;;  %v1363_v40 = vpack.c.bf16 %v577_v34, %v576_v33  ;;  %v743_v33 = vld [vmem:[#allocation12 + $0x68] sm:$0xff] }
 0x189   :  { %1314 = vmatpush3.bf16.msra.mxu1 %v1313_v42  ;;  %v578_v42 = vld [vmem:[#allocation10 + $0x160] sm:$0xff] }
 0x18a   :  { %1347 = vmatprep.subr.bf16.mxu1 %v1634_v1  ;;  %v1366_v45 = vpack.c.bf16 %v579_v43, %v578_v42  ;;  %v827_v42 = vld [vmem:[#allocation13 + $0x18] sm:$0xff] }
 0x23f   :  { %v320_v51 = vpop.f32.mrb[0].mxu1 }
 0x240   :  { %v321_v54 = vadd.f32 %v929_v46, %v320_v51  ;;  %v1094_v55 = vpop.f32.mrb[1].mxu1  ;;  %v546_v46 = vld [vmem:[#allocation10 + $0x60] sm:$0xff]  ;;  %v1369_v51 = vpack.c.bf16 %v581_v50, %v580_v49 }
 0x241   :  { %v1341_v48 = vpack.c.bf16 %v547_v47, %v546_v46  ;;  %v548_v55 = vld [vmem:[#allocation10 + $0x70] sm:$0xff]  ;;  %v832_v50 = vld [vmem:[#allocation13 + $0x40] sm:$0xff] }
 0x242   :  { %v324_v59 = vmax.f32 %v321_v54, 0.0  ;;  %v1343_v54 = vpack.c.bf16 %v565_v53, %v564_v52  ;;  %v830_v47 = vld [vmem:[#allocation13 + $0x30] sm:$0xff] }
 0x243   :  { %v834_v53 = vld [vmem:[#allocation13 + $0x50] sm:$0xff] }
 0x244   :  { %455 = vmatmul.mubr.f32.vlgmr.msra.gmra.mrb[2].mxu0 %v324_v59  ;;  %1128 = vmatmul.mubr.f32.vlgmr.msra.gmra.mrb[2].mxu1 %v324_v59  ;;  %v376_v59 = vshrl.u32 %v375_v58, 7 }
 0x245   :  { %1349 = vmatpush3.bf16.msra.mxu1 %v1348_v56  ;;  %1318 = vmatpush3.bf16.msra.mxu0 %v1317_v57  ;;  %v549_v56 = vld [vmem:[#allocation10 + $0x78] sm:$0xff] }
 0x246   :  { %1350 = vmatprep.subr.bf16.mxu1 %v1634_v1  ;;  %1320 = vmatprep.subr.bf16.mxu0 %v1319_v61  ;;  %v1345_v57 = vpack.c.bf16 %v549_v56, %v548_v55  ;;  %v377_v60 = vsub.s32 0, %v376_v59  ;;  %v385_v61 = vsub.s32 2, %v376_v59  ;;  %v381_v63 = vsub.s32 1, %v376_v59  ;;  %v836_v56 = vld [vmem:[#allocation13 + $0x60] sm:$0xff] }
 0x247   :  { %1162 = vmatprep.mubr.msk.f32.mxu1 %vm1633_vm0, %v1632_v0 }
 0x248   :  { %v378_v2 = vrot.slane %v373_v62, %v377_v60  ;;  %v386_v3 = vrot.slane %v373_v62, %v385_v61 }
 0x249   :  { %1352 = vmatpush3.bf16.msra.mxu1 %v1351_v4  ;;  %1322 = vmatpush3.bf16.msra.mxu0 %v1321_v5  ;;  %v382_v4 = vrot.slane %v373_v62, %v381_v63  ;;  %v930_v62 = vld [vmem:[%s1914_s8] ss:$0 sm:$0xff] }
 0x24a   :  { %1353 = vmatprep.subr.bf16.mxu1 %v1634_v1  ;;  %1324 = vmatprep.subr.bf16.mxu0 %v1323_v8 }
 0x24d   :  { %1355 = vmatpush3.bf16.msra.mxu1 %v1354_v13  ;;  %1326 = vmatpush3.bf16.msra.mxu0 %v1325_v14 }
 0x24e   :  { %1356 = vmatprep.subr.bf16.mxu1 %v1634_v1  ;;  %1328 = vmatprep.subr.bf16.mxu0 %v1327_v17 }
 0x251   :  { %1358 = vmatpush3.bf16.msra.mxu1 %v1357_v22  ;;  %1330 = vmatpush3.bf16.msra.mxu0 %v1329_v23  ;;  %v735_v22 = vld [vmem:[#allocation12 + $0x28] sm:$0xff] }
 0x252   :  { %1359 = vmatprep.subr.bf16.mxu1 %v1634_v1  ;;  %1332 = vmatprep.subr.bf16.mxu0 %v1331_v26  ;;  %v1378_v23 = vpack.c.bf16 %v735_v22, %v734_v21  ;;  %v1381_v26 = vpack.c.bf16 %v737_v25, %v736_v24 }
 0x255   :  { %1361 = vmatpush3.bf16.msra.mxu1 %v1360_v31  ;;  %1334 = vmatpush3.bf16.msra.mxu0 %v1333_v32  ;;  %v742_v32 = vld [vmem:[#allocation12 + $0x60] sm:$0xff] }
 0x256   :  { %1362 = vmatprep.subr.bf16.mxu1 %v1634_v1  ;;  %1336 = vmatprep.subr.bf16.mxu0 %v1335_v35  ;;  %v1390_v34 = vpack.c.bf16 %v743_v33, %v742_v32  ;;  %v744_v35 = vld [vmem:[#allocation12 + $0x70] sm:$0xff] }
 0x257   :  { %v1393_v37 = vpack.c.bf16 %v745_v36, %v744_v35 }
 0x259   :  { %1364 = vmatpush3.bf16.msra.mxu1 %v1363_v40  ;;  %1338 = vmatpush3.bf16.msra.mxu0 %v1337_v41  ;;  %v826_v40 = vld [vmem:[#allocation13 + $0x10] sm:$0xff]  ;;  %v1396_v41 = vpack.c.bf16 %v825_v39, %v824_v38 }
 0x25a   :  { %1365 = vmatprep.subr.bf16.mxu1 %v1634_v1  ;;  %1340 = vmatprep.subr.bf16.mxu0 %v1339_v44  ;;  %v1399_v43 = vpack.c.bf16 %v827_v42, %v826_v40  ;;  %v828_v44 = vld [vmem:[#allocation13 + $0x20] sm:$0xff] }
 0x25d   :  { %1367 = vmatpush3.bf16.msra.mxu1 %v1366_v45  ;;  %1342 = vmatpush3.bf16.msra.mxu0 %v1341_v48  ;;  %v829_v45 = vld [vmem:[#allocation13 + $0x28] sm:$0xff]  ;;  %v831_v48 = vld [vmem:[#allocation13 + $0x38] sm:$0xff] }
 0x25e   :  { %1368 = vmatprep.subr.bf16.mxu1 %v1634_v1  ;;  %1344 = vmatprep.subr.bf16.mxu0 %v1343_v54  ;;  %v1402_v46 = vpack.c.bf16 %v829_v45, %v828_v44  ;;  %v1405_v49 = vpack.c.bf16 %v831_v48, %v830_v47  ;;  %v835_v54 = vld [vmem:[#allocation13 + $0x58] sm:$0xff] }
 0x25f   :  { %v1411_v55 = vpack.c.bf16 %v835_v54, %v834_v53 }
 0x261   :  { %1370 = vmatpush3.bf16.msra.mxu1 %v1369_v51  ;;  %1346 = vmatpush3.bf16.msra.mxu0 %v1345_v57  ;;  %v833_v51 = vld [vmem:[#allocation13 + $0x48] sm:$0xff] }
 0x262   :  { %1395 = vmatprep.subr.bf16.mxu1 %v1634_v1  ;;  %1371 = vmatprep.subr.bf16.mxu0 %v1634_v1  ;;  %v1408_v52 = vpack.c.bf16 %v833_v51, %v832_v50  ;;  %v837_v57 = vld [vmem:[#allocation13 + $0x68] sm:$0xff] }
 0x263   :  { %v1414_v58 = vpack.c.bf16 %v837_v57, %v836_v56 }
 0x317   :  { %v456_v5 = vpop.f32.mrb[2].mxu0  ;;  %v527_v6 = vpop.f32.mrb[2].mxu1 }
 0x318   :  { %v457_v7 = vadd.f32 %v456_v5, %v378_v2  ;;  %v528_v8 = vadd.f32 %v527_v6, %v386_v3  ;;  %v458_v9 = vpop.f32.mrb[3].mxu0  ;;  %v1129_v10 = vpop.f32.mrb[3].mxu1  ;;  %v838_v6 = vld [vmem:[#allocation13 + $0x70] sm:$0xff] }
 0x319   :  { %v459_v13 = vadd.f32 %v458_v9, %v382_v4 }
 0x31a   :  { %v533_v14 = vmax.f32 %v528_v8, 0.0  ;;  %v531_v17 = vmax.f32 %v457_v7, 0.0  ;;  %v839_v7 = vld [vmem:[#allocation13 + $0x78] sm:$0xff] }
 0x31b   :  { %v532_v15 = vmax.f32 %v459_v13, 0.0  ;;  %v1417_v8 = vpack.c.bf16 %v839_v7, %v838_v6  ;;  %v932_v13 = vld [vmem:[%s1918_s12] ss:$0 sm:$0xff] }
 0x31c   :  { %1163 = vmatmul.mubr.f32.vlgmr.msra.gmra.mrb[4].mxu1 %v533_v14 }
 0x31d   :  { %653 = vmatprep.mubr.f32.mxu0 %v532_v15  ;;  %1232 = vmatprep.mubr.msk.f32.mxu1 %vm1633_vm0, %v1632_v0 }
 0x31e   :  { %654 = vmatmul.mubr.f32.vlgmr.msra.gmra.mrb[4].mxu0 %v531_v17  ;;  %1397 = vmatpush3.bf16.msra.mxu1 %v1396_v41 }
 0x31f   :  { %1373 = vmatpush3.bf16.msra.mxu0 %v1372_v16  ;;  %1197 = vmatprep.mubr.msk.f32.mxu0 %vm1633_vm0, %v1632_v0  ;;  %v740_v0 = vld [vmem:[#allocation12 + $0x50] sm:$0xff] }
 0x320   :  { %1374 = vmatprep.subr.bf16.mxu0 %v1634_v1  ;;  %v1387_v31 = vpack.c.bf16 %v741_v30, %v740_v0  ;;  %1398 = vmatprep.subr.bf16.mxu1 %v1634_v1 }
 0x322   :  { %1400 = vmatpush3.bf16.msra.mxu1 %v1399_v43 }
 0x323   :  { %1376 = vmatpush3.bf16.msra.mxu0 %v1375_v20  ;;  %1401 = vmatprep.subr.bf16.mxu1 %v1634_v1 }
 0x324   :  { %1377 = vmatprep.subr.bf16.mxu0 %v1634_v1 }
 0x326   :  { %1403 = vmatpush3.bf16.msra.mxu1 %v1402_v46 }
 0x327   :  { %1379 = vmatpush3.bf16.msra.mxu0 %v1378_v23  ;;  %1404 = vmatprep.subr.bf16.mxu1 %v1634_v1 }
 0x328   :  { %1380 = vmatprep.subr.bf16.mxu0 %v1634_v1 }
 0x32a   :  { %1406 = vmatpush3.bf16.msra.mxu1 %v1405_v49 }
 0x32b   :  { %1382 = vmatpush3.bf16.msra.mxu0 %v1381_v26  ;;  %1407 = vmatprep.subr.bf16.mxu1 %v1634_v1 }
 0x32c   :  { %1383 = vmatprep.subr.bf16.mxu0 %v1634_v1 }
 0x32e   :  { %1409 = vmatpush3.bf16.msra.mxu1 %v1408_v52 }
 0x32f   :  { %1385 = vmatpush3.bf16.msra.mxu0 %v1384_v29  ;;  %1410 = vmatprep.subr.bf16.mxu1 %v1634_v1 }
 0x330   :  { %1386 = vmatprep.subr.bf16.mxu0 %v1634_v1 }
 0x332   :  { %1412 = vmatpush3.bf16.msra.mxu1 %v1411_v55 }
 0x333   :  { %1388 = vmatpush3.bf16.msra.mxu0 %v1387_v31  ;;  %1413 = vmatprep.subr.bf16.mxu1 %v1634_v1 }
 0x334   :  { %1389 = vmatprep.subr.bf16.mxu0 %v1634_v1 }
 0x336   :  { %1415 = vmatpush3.bf16.msra.mxu1 %v1414_v58 }
 0x337   :  { %1391 = vmatpush3.bf16.msra.mxu0 %v1390_v34  ;;  %1416 = vmatprep.subr.bf16.mxu1 %v1634_v1 }
 0x338   :  { %1392 = vmatprep.subr.bf16.mxu0 %v1634_v1  ;;  %v931_v1 = vld [vmem:[%s1916_s10] ss:$0 sm:$0xff] }
 0x33a   :  { %1418 = vmatpush3.bf16.msra.mxu1 %v1417_v8 }
 0x33b   :  { %1394 = vmatpush3.bf16.msra.mxu0 %v1393_v37 }
 0x3ef   :  { %v725_v59 = vpop.f32.mrb[4].mxu1 }
 0x3f0   :  { %v1164_v60 = vpop.f32.mrb[5].mxu1 }
 0x3f1   :  { %v1001_v61 = vpop.f32.mrb[4].mxu0 }
 0x3f2   :  { %v1002_v63 = vpop.f32.mrb[5].mxu0 }
 0x3f3   :  { %v1003_v2 = vadd.f32 %v1002_v63, %v1001_v61 }
 0x3f5   :  { %v656_v3 = vadd.f32 %v1003_v2, %v930_v62 }
 0x3f7   :  { %v726_v4 = vadd.f32 %v725_v59, %v656_v3 }
 0x3f9   :  { %v729_v5 = vmax.f32 %v726_v4, 0.0 }
 0x3fb   :  { %1198 = vmatmul.mubr.f32.vlgmr.msra.gmra.mrb[6].mxu0 %v729_v5 }
 0x4ce   :  { %v819_v9 = vpop.f32.mrb[6].mxu0 }
 0x4cf   :  { %v820_v10 = vadd.f32 %v931_v1, %v819_v9  ;;  %v1199_v11 = vpop.f32.mrb[7].mxu0 }
 0x4d1   :  { %v823_v12 = vmax.f32 %v820_v10, 0.0 }
 0x4d3   :  { %1233 = vmatmul.mubr.f32.vlgmr.msra.gmra.mrb[6].mxu1 %v823_v12 }
 0x5a6   :  { %v913_v14 = vpop.f32.mrb[6].mxu1 }
 0x5a7   :  { %v914_v15 = vadd.f32 %v932_v13, %v913_v14  ;;  %v1234_v16 = vpop.f32.mrb[7].mxu1 }
 0x5a9   :  { %917 = vst [vmem:[%s1919_s13] sm:$0xff] %v914_v15 }
 0x5aa   :  { %922 = vsyncpa [#allocation3], 1 }
 0x5ab   :  { %923 = vsyncpa [#allocation5], 1 }
 0x5ac   :  { %924 = vsyncpa [#allocation8], 1 }
 0x5ad   :  { %925 = vsyncpa [#allocation11], 1 }
 0x5ae   :  { %926 = vsyncpa [#allocation14], 1 }

</bundles_post_ra>
